<compile_context>
chip_gen: v7x
topology: tpu7x:2x2x1
jax: 0.10.0
libtpu: 0.0.40
codegen_flags: <defaults>
</compile_context>

<pallas_src>
import functools

import numpy as np
import jax
import jax.numpy as jnp
from jax.experimental import pallas as pl
from jax.experimental.pallas import tpu as pltpu

_EPS = 1e-8  # insurance against degenerate boxes (mandatory with approx reciprocals)


# -----------------------------------------------------------------------------
# Pallas kernel: one (row_tile, NT_pad) slab of the matching-cost matrix.
# -----------------------------------------------------------------------------
def _cost_matrix_kernel(logits_ref, neg_onehot_ref, pbox_ref, tbox_t_ref, c_ref,
                        *, cost_bbox, cost_giou):
    # ---- softmax over (padded) classes; pad columns hold -1e9 so exp underflows to 0 ----
    logits = logits_ref[...]                                          # (TM, Cp)
    m = jnp.max(logits, axis=-1, keepdims=True)
    e = jnp.exp(logits - m)
    prob = e * pl.reciprocal(jnp.sum(e, axis=-1, keepdims=True), approx=True)

    # ---- classification cost: prob @ (-cost_class * one_hot)  (weight folded in) -------
    acc = jnp.dot(prob, neg_onehot_ref[...],
                  preferred_element_type=jnp.float32)                 # (TM, NTp)

    pbox = pbox_ref[...]                                              # (TM, 4) cxcywh
    tT = tbox_t_ref[...]                                              # (4, NTp) cxcywh
    pcx, pcy, pw, ph = (pbox[:, k:k + 1] for k in range(4))           # each (TM, 1)
    tcx, tcy, tw, th = (tT[k:k + 1, :] for k in range(4))             # each (1, NTp)

    # ---- L1 cdist (torch.cdist p=1) on cxcywh directly ---------------------------------
    cb = jnp.abs(pcx - tcx)
    cb = cb + jnp.abs(pcy - tcy)
    cb = cb + jnp.abs(pw - tw)
    cb = cb + jnp.abs(ph - th)
    acc = acc + cost_bbox * cb

    # ---- generalized box IoU (cxcywh -> xyxy) -------------------------------------------
    px0, px1 = pcx - 0.5 * pw, pcx + 0.5 * pw
    py0, py1 = pcy - 0.5 * ph, pcy + 0.5 * ph
    tx0, tx1 = tcx - 0.5 * tw, tcx + 0.5 * tw
    ty0, ty1 = tcy - 0.5 * th, tcy + 0.5 * th

    parea = (px1 - px0) * (py1 - py0)                                 # (TM, 1)
    tarea = (tx1 - tx0) * (ty1 - ty0)                                 # (1, NTp)

    iw = jnp.maximum(jnp.minimum(px1, tx1) - jnp.maximum(px0, tx0), 0.0)
    ih = jnp.maximum(jnp.minimum(py1, ty1) - jnp.maximum(py0, ty0), 0.0)
    inter = iw * ih                                                   # (TM, NTp)
    union = parea + tarea - inter
    iou = inter * pl.reciprocal(union + _EPS, approx=True)

    ew = jnp.maximum(jnp.maximum(px1, tx1) - jnp.minimum(px0, tx0), 0.0)
    eh = jnp.maximum(jnp.maximum(py1, ty1) - jnp.minimum(py0, ty0), 0.0)
    earea = ew * eh
    giou = iou - (earea - union) * pl.reciprocal(earea + _EPS, approx=True)
    acc = acc - cost_giou * giou

    c_ref[...] = acc


def _round_up(x, m):
    return (x + m - 1) // m * m


def compute_cost_matrix(pred_logits, pred_boxes, tgt_ids, tgt_boxes,
                        cost_class=1.0, cost_bbox=1.0, cost_giou=1.0,
                        row_tile=256):
    """Returns C of shape (bs, num_queries, total_targets), float32."""
    bs, nq, num_classes = pred_logits.shape
    nt = int(tgt_boxes.shape[0])
    rows = bs * nq

    # Padding for TPU tiling: classes/targets to lane width, rows to the row tile.
    c_pad = _round_up(max(num_classes, 128), 128)
    nt_pad = _round_up(max(nt, 128), 128)
    tm = min(row_tile, _round_up(rows, 8))         # multiple of 8
    rows_pad = _round_up(rows, tm)

    logits2d = pred_logits.reshape(rows, num_classes).astype(jnp.float32)
    pbox2d = pred_boxes.reshape(rows, 4).astype(jnp.float32)

    # Padded class columns get -1e9 (exp underflows -> no effect on the softmax denominator).
    logits_p = jnp.full((rows_pad, c_pad), -1e9, jnp.float32)
    logits_p = logits_p.at[:rows, :num_classes].set(logits2d)

    # Padded rows / target columns use a dummy valid box so the GIoU math never divides by 0.
    dummy_box = jnp.array([0.5, 0.5, 1.0, 1.0], jnp.float32)
    pbox_p = jnp.tile(dummy_box, (rows_pad, 1)).at[:rows, :].set(pbox2d)
    tbox_t_p = jnp.tile(dummy_box[:, None], (1, nt_pad)).at[:, :nt].set(
        tgt_boxes.astype(jnp.float32).T)

    # Fold -cost_class into the one-hot (tiny (C, NT) scale), zero-pad target columns.
    onehot = jax.nn.one_hot(tgt_ids, c_pad, dtype=jnp.float32).T       # (c_pad, nt)
    neg_onehot_p = jnp.zeros((c_pad, nt_pad), jnp.float32).at[:, :nt].set(
        (-float(cost_class)) * onehot)

    kernel = functools.partial(
        _cost_matrix_kernel,
        cost_bbox=float(cost_bbox),
        cost_giou=float(cost_giou),
    )

    grid = (rows_pad // tm,)
    c2d_padded = pl.pallas_call(
        kernel,
        out_shape=jax.ShapeDtypeStruct((rows_pad, nt_pad), jnp.float32),
        grid=grid,
        in_specs=[
            pl.BlockSpec((tm, c_pad), lambda i: (i, 0)),      # logits: row-tiled
            pl.BlockSpec((c_pad, nt_pad), lambda i: (0, 0)),  # -w*one-hot: resident
            pl.BlockSpec((tm, 4), lambda i: (i, 0)),          # pred boxes: row-tiled
            pl.BlockSpec((4, nt_pad), lambda i: (0, 0)),      # tgt boxes: resident
        ],
        out_specs=pl.BlockSpec((tm, nt_pad), lambda i: (i, 0)),
        compiler_params=pltpu.CompilerParams(
            dimension_semantics=("parallel",),
            vmem_limit_bytes=32 * 1024 * 1024,
        ),
    )(logits_p, neg_onehot_p, pbox_p, tbox_t_p)

    # Strip the padding before any per-batch target slicing.
    return c2d_padded[:rows, :nt].reshape(bs, nq, nt)


# -----------------------------------------------------------------------------
# Host-side rectangular Hungarian assignment (min-cost), pure numpy/python.
# -----------------------------------------------------------------------------
def _linear_sum_assignment(cost):
    cost = np.asarray(cost, dtype=np.float64)
    transposed = False
    if cost.shape[0] > cost.shape[1]:
        cost = cost.T
        transposed = True
    n, m = cost.shape                       # n <= m
    INF = float("inf")
    u = [0.0] * (n + 1)
    v = [0.0] * (m + 1)
    p = [0] * (m + 1)
    way = [0] * (m + 1)
    for i in range(1, n + 1):
        p[0] = i
        j0 = 0
        minv = [INF] * (m + 1)
        used = [False] * (m + 1)
        while True:
            used[j0] = True
            i0 = p[j0]
            delta = INF
            j1 = -1
            for j in range(1, m + 1):
                if not used[j]:
                    cur = cost[i0 - 1][j - 1] - u[i0] - v[j]
                    if cur < minv[j]:
                        minv[j] = cur
                        way[j] = j0
                    if minv[j] < delta:
                        delta = minv[j]
                        j1 = j
            for j in range(0, m + 1):
                if used[j]:
                    u[p[j]] += delta
                    v[j] -= delta
                else:
                    minv[j] -= delta
            j0 = j1
            if p[j0] == 0:
                break
        while True:
            j1 = way[j0]
            p[j0] = p[j1]
            j0 = j1
            if j0 == 0:
                break
    rows, cols = [], []
    for j in range(1, m + 1):
        if p[j] != 0:
            rows.append(p[j] - 1)
            cols.append(j - 1)
    rows = np.asarray(rows, dtype=np.int64)
    cols = np.asarray(cols, dtype=np.int64)
    if transposed:
        rows, cols = cols, rows
    order = np.argsort(rows)
    return rows[order], cols[order]


# -----------------------------------------------------------------------------
# HungarianMatcher forward (JAX/Pallas version).
# -----------------------------------------------------------------------------
def hungarian_matcher(outputs, targets, cost_class=1.0, cost_bbox=1.0, cost_giou=1.0):
    assert cost_class != 0 or cost_bbox != 0 or cost_giou != 0, "all costs cant be 0"
    pred_logits = outputs["pred_logits"]
    pred_boxes = outputs["pred_boxes"]
    bs, num_queries = pred_logits.shape[:2]

    tgt_ids = jnp.concatenate([t["labels"] for t in targets], axis=0)
    tgt_boxes = jnp.concatenate([t["boxes"] for t in targets], axis=0)
    sizes = [int(t["boxes"].shape[0]) for t in targets]

    C = compute_cost_matrix(pred_logits, pred_boxes, tgt_ids, tgt_boxes,
                            cost_class=cost_class, cost_bbox=cost_bbox,
                            cost_giou=cost_giou)
    C = jax.block_until_ready(C)
    C_np = np.asarray(C)                                   # (bs, nq, total_targets)

    indices = []
    offset = 0
    for b, sz in enumerate(sizes):
        c_b = C_np[b, :, offset:offset + sz]               # (num_queries, sz)
        i, j = _linear_sum_assignment(c_b)
        indices.append((i.astype(np.int64), j.astype(np.int64)))
        offset += sz
    return indices


# -----------------------------------------------------------------------------
# Demo
# -----------------------------------------------------------------------------
if __name__ == "__main__":
    key = jax.random.PRNGKey(0)
    bs, num_queries, num_classes = 2, 8, 10
    tgt_sizes = [3, 4]

    k1, k2, k3, k4, k5, k6 = jax.random.split(key, 6)

    pred_logits = jax.random.normal(k1, (bs, num_queries, num_classes), jnp.float32)
    # cxcywh: centers in (0.25, 0.75), w/h in (0.05, 0.45)  -> valid positive boxes
    pc = 0.25 + 0.5 * jax.random.uniform(k2, (bs, num_queries, 2))
    pwh = 0.05 + 0.4 * jax.random.uniform(k3, (bs, num_queries, 2))
    pred_boxes = jnp.concatenate([pc, pwh], axis=-1).astype(jnp.float32)

    targets = []
    tk = [k4, k5]
    for b, sz in enumerate(tgt_sizes):
        ka, kb, kc = jax.random.split(tk[b], 3)
        labels = jax.random.randint(ka, (sz,), 0, num_classes, dtype=jnp.int32)
        tc = 0.25 + 0.5 * jax.random.uniform(kb, (sz, 2))
        twh = 0.05 + 0.4 * jax.random.uniform(kc, (sz, 2))
        boxes = jnp.concatenate([tc, twh], axis=-1).astype(jnp.float32)
        targets.append({"labels": labels, "boxes": boxes})

    outputs = {"pred_logits": pred_logits, "pred_boxes": pred_boxes}

    indices = hungarian_matcher(outputs, targets,
                                cost_class=1.0, cost_bbox=1.0, cost_giou=1.0)

    # sanity: one (i, j) pair per batch element, correct lengths
    assert len(indices) == bs
    for (i, j), sz in zip(indices, tgt_sizes):
        assert len(i) == len(j) == min(num_queries, sz)

    print("KERNEL_OK")
</pallas_src>

<mosaic_0001>
module attributes {stable_mosaic.version = 11 : i64} {
  func.func @_cost_matrix_kernel(%arg0: i32, %arg1: memref<16x128xf32, #tpu.memory_space<vmem>>, %arg2: memref<128x128xf32, #tpu.memory_space<vmem>>, %arg3: memref<16x4xf32, #tpu.memory_space<vmem>>, %arg4: memref<4x128xf32, #tpu.memory_space<vmem>>, %arg5: memref<16x128xf32, #tpu.memory_space<vmem>>) attributes {dimension_semantics = [#tpu.dimension_semantics<parallel>], iteration_bounds = array<i64: 1>, scalar_prefetch = 0 : i64, scratch_operands = 0 : i64, tpu.core_type = #tpu.core_type<tc>, window_params = [{transform_indices = @transform_0, window_bounds = array<i64: 16, 128>}, {pipeline_mode = #tpu.pipeline_mode<synchronous>, transform_indices = @transform_1, window_bounds = array<i64: 128, 128>}, {transform_indices = @transform_2, window_bounds = array<i64: 16, 4>}, {pipeline_mode = #tpu.pipeline_mode<synchronous>, transform_indices = @transform_3, window_bounds = array<i64: 4, 128>}, {transform_indices = @transform_4, window_bounds = array<i64: 16, 128>}]} {
    %c0 = arith.constant 0 : index
    %c0_0 = arith.constant 0 : index
    %0 = vector.load %arg1[%c0, %c0_0] : memref<16x128xf32, #tpu.memory_space<vmem>>, vector<16x128xf32>
    %cst = arith.constant dense<0xFF800000> : vector<16xf32>
    %1 = vector.multi_reduction <maximumf>, %0, %cst [1] : vector<16x128xf32> to vector<16xf32>
    %2 = vector.shape_cast %1 : vector<16xf32> to vector<16x1xf32>
    %3 = vector.broadcast %2 : vector<16x1xf32> to vector<16x128xf32>
    %4 = arith.subf %0, %3 : vector<16x128xf32>
    %5 = math.exp %4 : vector<16x128xf32>
    %cst_1 = arith.constant dense<0.000000e+00> : vector<16xf32>
    %6 = vector.multi_reduction <add>, %5, %cst_1 [1] : vector<16x128xf32> to vector<16xf32>
    %7 = vector.shape_cast %6 : vector<16xf32> to vector<16x1xf32>
    %8 = tpu.reciprocal %7 {approx = true} : vector<16x1xf32> -> vector<16x1xf32>
    %9 = vector.broadcast %8 : vector<16x1xf32> to vector<16x128xf32>
    %10 = arith.mulf %5, %9 : vector<16x128xf32>
    %c0_2 = arith.constant 0 : index
    %c0_3 = arith.constant 0 : index
    %11 = vector.load %arg2[%c0_2, %c0_3] : memref<128x128xf32, #tpu.memory_space<vmem>>, vector<128x128xf32>
    %cst_4 = arith.constant dense<0.000000e+00> : vector<16x128xf32>
    %12 = tpu.matmul %10, %11, %cst_4 {dimension_numbers = #tpu.dot_dimension_numbers<[1], [0], [0], [1], [0, 0, 1, 1], [], []>} : vector<16x128xf32>, vector<128x128xf32>, vector<16x128xf32> -> vector<16x128xf32>
    %c0_5 = arith.constant 0 : index
    %c0_6 = arith.constant 0 : index
    %13 = vector.load %arg3[%c0_5, %c0_6] : memref<16x4xf32, #tpu.memory_space<vmem>>, vector<16x4xf32>
    %c0_7 = arith.constant 0 : index
    %c0_8 = arith.constant 0 : index
    %14 = vector.load %arg4[%c0_7, %c0_8] : memref<4x128xf32, #tpu.memory_space<vmem>>, vector<4x128xf32>
    %15 = vector.extract_strided_slice %13 {offsets = [0, 0], sizes = [16, 1], strides = [1, 1]} : vector<16x4xf32> to vector<16x1xf32>
    %16 = vector.extract_strided_slice %13 {offsets = [0, 1], sizes = [16, 1], strides = [1, 1]} : vector<16x4xf32> to vector<16x1xf32>
    %17 = vector.extract_strided_slice %13 {offsets = [0, 2], sizes = [16, 1], strides = [1, 1]} : vector<16x4xf32> to vector<16x1xf32>
    %18 = vector.extract_strided_slice %13 {offsets = [0, 3], sizes = [16, 1], strides = [1, 1]} : vector<16x4xf32> to vector<16x1xf32>
    %19 = vector.extract_strided_slice %14 {offsets = [0, 0], sizes = [1, 128], strides = [1, 1]} : vector<4x128xf32> to vector<1x128xf32>
    %20 = vector.extract_strided_slice %14 {offsets = [1, 0], sizes = [1, 128], strides = [1, 1]} : vector<4x128xf32> to vector<1x128xf32>
    %21 = vector.extract_strided_slice %14 {offsets = [2, 0], sizes = [1, 128], strides = [1, 1]} : vector<4x128xf32> to vector<1x128xf32>
    %22 = vector.extract_strided_slice %14 {offsets = [3, 0], sizes = [1, 128], strides = [1, 1]} : vector<4x128xf32> to vector<1x128xf32>
    %23 = vector.broadcast %15 : vector<16x1xf32> to vector<16x128xf32>
    %24 = vector.broadcast %19 : vector<1x128xf32> to vector<16x128xf32>
    %25 = arith.subf %23, %24 : vector<16x128xf32>
    %26 = math.absf %25 : vector<16x128xf32>
    %27 = vector.broadcast %16 : vector<16x1xf32> to vector<16x128xf32>
    %28 = vector.broadcast %20 : vector<1x128xf32> to vector<16x128xf32>
    %29 = arith.subf %27, %28 : vector<16x128xf32>
    %30 = math.absf %29 : vector<16x128xf32>
    %31 = arith.addf %26, %30 : vector<16x128xf32>
    %32 = vector.broadcast %17 : vector<16x1xf32> to vector<16x128xf32>
    %33 = vector.broadcast %21 : vector<1x128xf32> to vector<16x128xf32>
    %34 = arith.subf %32, %33 : vector<16x128xf32>
    %35 = math.absf %34 : vector<16x128xf32>
    %36 = arith.addf %31, %35 : vector<16x128xf32>
    %37 = vector.broadcast %18 : vector<16x1xf32> to vector<16x128xf32>
    %38 = vector.broadcast %22 : vector<1x128xf32> to vector<16x128xf32>
    %39 = arith.subf %37, %38 : vector<16x128xf32>
    %40 = math.absf %39 : vector<16x128xf32>
    %41 = arith.addf %36, %40 : vector<16x128xf32>
    %cst_9 = arith.constant 1.000000e+00 : f32
    %42 = vector.broadcast %cst_9 : f32 to vector<16x128xf32>
    %43 = arith.mulf %42, %41 : vector<16x128xf32>
    %44 = arith.addf %12, %43 : vector<16x128xf32>
    %cst_10 = arith.constant 5.000000e-01 : f32
    %45 = vector.broadcast %cst_10 : f32 to vector<16x1xf32>
    %46 = arith.mulf %45, %17 : vector<16x1xf32>
    %47 = arith.subf %15, %46 : vector<16x1xf32>
    %cst_11 = arith.constant 5.000000e-01 : f32
    %48 = vector.broadcast %cst_11 : f32 to vector<16x1xf32>
    %49 = arith.mulf %48, %17 : vector<16x1xf32>
    %50 = arith.addf %15, %49 : vector<16x1xf32>
    %cst_12 = arith.constant 5.000000e-01 : f32
    %51 = vector.broadcast %cst_12 : f32 to vector<16x1xf32>
    %52 = arith.mulf %51, %18 : vector<16x1xf32>
    %53 = arith.subf %16, %52 : vector<16x1xf32>
    %cst_13 = arith.constant 5.000000e-01 : f32
    %54 = vector.broadcast %cst_13 : f32 to vector<16x1xf32>
    %55 = arith.mulf %54, %18 : vector<16x1xf32>
    %56 = arith.addf %16, %55 : vector<16x1xf32>
    %cst_14 = arith.constant 5.000000e-01 : f32
    %57 = vector.broadcast %cst_14 : f32 to vector<1x128xf32>
    %58 = arith.mulf %57, %21 : vector<1x128xf32>
    %59 = arith.subf %19, %58 : vector<1x128xf32>
    %cst_15 = arith.constant 5.000000e-01 : f32
    %60 = vector.broadcast %cst_15 : f32 to vector<1x128xf32>
    %61 = arith.mulf %60, %21 : vector<1x128xf32>
    %62 = arith.addf %19, %61 : vector<1x128xf32>
    %cst_16 = arith.constant 5.000000e-01 : f32
    %63 = vector.broadcast %cst_16 : f32 to vector<1x128xf32>
    %64 = arith.mulf %63, %22 : vector<1x128xf32>
    %65 = arith.subf %20, %64 : vector<1x128xf32>
    %cst_17 = arith.constant 5.000000e-01 : f32
    %66 = vector.broadcast %cst_17 : f32 to vector<1x128xf32>
    %67 = arith.mulf %66, %22 : vector<1x128xf32>
    %68 = arith.addf %20, %67 : vector<1x128xf32>
    %69 = arith.subf %50, %47 : vector<16x1xf32>
    %70 = arith.subf %56, %53 : vector<16x1xf32>
    %71 = arith.mulf %69, %70 : vector<16x1xf32>
    %72 = arith.subf %62, %59 : vector<1x128xf32>
    %73 = arith.subf %68, %65 : vector<1x128xf32>
    %74 = arith.mulf %72, %73 : vector<1x128xf32>
    %75 = vector.broadcast %50 : vector<16x1xf32> to vector<16x128xf32>
    %76 = vector.broadcast %62 : vector<1x128xf32> to vector<16x128xf32>
    %77 = arith.minimumf %75, %76 : vector<16x128xf32>
    %78 = vector.broadcast %47 : vector<16x1xf32> to vector<16x128xf32>
    %79 = vector.broadcast %59 : vector<1x128xf32> to vector<16x128xf32>
    %80 = arith.maximumf %78, %79 : vector<16x128xf32>
    %81 = arith.subf %77, %80 : vector<16x128xf32>
    %cst_18 = arith.constant 0.000000e+00 : f32
    %82 = vector.broadcast %cst_18 : f32 to vector<16x128xf32>
    %83 = arith.maximumf %81, %82 : vector<16x128xf32>
    %84 = vector.broadcast %56 : vector<16x1xf32> to vector<16x128xf32>
    %85 = vector.broadcast %68 : vector<1x128xf32> to vector<16x128xf32>
    %86 = arith.minimumf %84, %85 : vector<16x128xf32>
    %87 = vector.broadcast %53 : vector<16x1xf32> to vector<16x128xf32>
    %88 = vector.broadcast %65 : vector<1x128xf32> to vector<16x128xf32>
    %89 = arith.maximumf %87, %88 : vector<16x128xf32>
    %90 = arith.subf %86, %89 : vector<16x128xf32>
    %cst_19 = arith.constant 0.000000e+00 : f32
    %91 = vector.broadcast %cst_19 : f32 to vector<16x128xf32>
    %92 = arith.maximumf %90, %91 : vector<16x128xf32>
    %93 = arith.mulf %83, %92 : vector<16x128xf32>
    %94 = vector.broadcast %71 : vector<16x1xf32> to vector<16x128xf32>
    %95 = vector.broadcast %74 : vector<1x128xf32> to vector<16x128xf32>
    %96 = arith.addf %94, %95 : vector<16x128xf32>
    %97 = arith.subf %96, %93 : vector<16x128xf32>
    %cst_20 = arith.constant 9.99999993E-9 : f32
    %98 = vector.broadcast %cst_20 : f32 to vector<16x128xf32>
    %99 = arith.addf %97, %98 : vector<16x128xf32>
    %100 = tpu.reciprocal %99 {approx = true} : vector<16x128xf32> -> vector<16x128xf32>
    %101 = arith.mulf %93, %100 : vector<16x128xf32>
    %102 = vector.broadcast %50 : vector<16x1xf32> to vector<16x128xf32>
    %103 = vector.broadcast %62 : vector<1x128xf32> to vector<16x128xf32>
    %104 = arith.maximumf %102, %103 : vector<16x128xf32>
    %105 = vector.broadcast %47 : vector<16x1xf32> to vector<16x128xf32>
    %106 = vector.broadcast %59 : vector<1x128xf32> to vector<16x128xf32>
    %107 = arith.minimumf %105, %106 : vector<16x128xf32>
    %108 = arith.subf %104, %107 : vector<16x128xf32>
    %cst_21 = arith.constant 0.000000e+00 : f32
    %109 = vector.broadcast %cst_21 : f32 to vector<16x128xf32>
    %110 = arith.maximumf %108, %109 : vector<16x128xf32>
    %111 = vector.broadcast %56 : vector<16x1xf32> to vector<16x128xf32>
    %112 = vector.broadcast %68 : vector<1x128xf32> to vector<16x128xf32>
    %113 = arith.maximumf %111, %112 : vector<16x128xf32>
    %114 = vector.broadcast %53 : vector<16x1xf32> to vector<16x128xf32>
    %115 = vector.broadcast %65 : vector<1x128xf32> to vector<16x128xf32>
    %116 = arith.minimumf %114, %115 : vector<16x128xf32>
    %117 = arith.subf %113, %116 : vector<16x128xf32>
    %cst_22 = arith.constant 0.000000e+00 : f32
    %118 = vector.broadcast %cst_22 : f32 to vector<16x128xf32>
    %119 = arith.maximumf %117, %118 : vector<16x128xf32>
    %120 = arith.mulf %110, %119 : vector<16x128xf32>
    %121 = arith.subf %120, %97 : vector<16x128xf32>
    %cst_23 = arith.constant 9.99999993E-9 : f32
    %122 = vector.broadcast %cst_23 : f32 to vector<16x128xf32>
    %123 = arith.addf %120, %122 : vector<16x128xf32>
    %124 = tpu.reciprocal %123 {approx = true} : vector<16x128xf32> -> vector<16x128xf32>
    %125 = arith.mulf %121, %124 : vector<16x128xf32>
    %126 = arith.subf %101, %125 : vector<16x128xf32>
    %cst_24 = arith.constant 1.000000e+00 : f32
    %127 = vector.broadcast %cst_24 : f32 to vector<16x128xf32>
    %128 = arith.mulf %127, %126 : vector<16x128xf32>
    %129 = arith.subf %44, %128 : vector<16x128xf32>
    %c0_25 = arith.constant 0 : index
    %c0_26 = arith.constant 0 : index
    %130 = vector.load %arg5[%c0_25, %c0_26] : memref<16x128xf32, #tpu.memory_space<vmem>>, vector<16x128xf32>
    tpu.vector_store %arg5[%c0_25, %c0_26], %129 {strides = array<i32>} : memref<16x128xf32, #tpu.memory_space<vmem>>, vector<16x128xf32>,
    return
  }
  func.func @transform_0(%arg0: i32) -> (i32, i32) {
    %c0_i32 = arith.constant 0 : i32
    %c0_i32_0 = arith.constant 0 : i32
    return %arg0, %c0_i32 : i32, i32
  }
  func.func @transform_1(%arg0: i32) -> (i32, i32) {
    %c0_i32 = arith.constant 0 : i32
    %c0_i32_0 = arith.constant 0 : i32
    %c0_i32_1 = arith.constant 0 : i32
    return %c0_i32, %c0_i32_0 : i32, i32
  }
  func.func @transform_2(%arg0: i32) -> (i32, i32) {
    %c0_i32 = arith.constant 0 : i32
    %c0_i32_0 = arith.constant 0 : i32
    return %arg0, %c0_i32 : i32, i32
  }
  func.func @transform_3(%arg0: i32) -> (i32, i32) {
    %c0_i32 = arith.constant 0 : i32
    %c0_i32_0 = arith.constant 0 : i32
    %c0_i32_1 = arith.constant 0 : i32
    return %c0_i32, %c0_i32_0 : i32, i32
  }
  func.func @transform_4(%arg0: i32) -> (i32, i32) {
    %c0_i32 = arith.constant 0 : i32
    %c0_i32_0 = arith.constant 0 : i32
    return %arg0, %c0_i32 : i32, i32
  }
}

</mosaic_0001>

<bundles_post_ra>
// kernel: tpu_custom_call.1
= control target key start
LH: loop header
LB: loop body
LE: loop exit
PB: predicated region body
PF: predicated region fallthrough
CT: control target
= control target key end

     0   :  { %9 = vsyncpa [#allocation3], 0  ;;  %s707_s0 = inlined_call_operand.vmem [shape: f32[16,128], index: 0, kind: input, shape index: {}]   ;;  %s708_s1 = inlined_call_operand.hbm [shape: f32[128,128], index: 1, kind: input, shape index: {}]   ;;  %s709_s2 = inlined_call_operand.vmem [shape: f32[16,4], index: 2, kind: input, shape index: {}]   ;;  %s710_s3 = inlined_call_operand.vmem [shape: f32[4,128], index: 3, kind: input, shape index: {}]   ;;  %s711_s4 = inlined_call_operand.hbm [shape: f32[16,128], index: 4, kind: output, shape index: {}]  }
   0x1   :  { %10 = vsyncpa [#allocation4], 0  ;;  %s568_s15 = smov [#allocation2]   ;;  %s520_s19 = scalar_lea.hbm %s708_s1, 2048 }
   0x2   :  { %s18_s16 = sshll.u32 %s568_s15, 4  ;;  %p521_p0 = scmp.ne.s32.totalorder %s708_s1, %s520_s19  ;;  %s19_s16 = int_to_ptr.vmem [resolvable:$true] %s18_s16 }
   0x3   :  { %p524_p1 = scmp.lt.u32.totalorder %s520_s19, %s708_s1 }
   0x5   :  { %p526_p2 = pnand %p524_p1, %p521_p0 }
   0x7   :  { %529 = shalt.err (!%p526_p2)
}
   0x8   :  { %s530_s24 = scalar_lea.vmem %s19_s16, 2048  ;;  %p535_p4 = scmp.lt.s32.totalorder %s19_s16, %s19_s16 }
   0x9   :  { %p531_p3 = scmp.ne.s32.totalorder %s19_s16, %s530_s24  ;;  %p536_p5 = scmp.lt.s32.totalorder %s530_s24, %s530_s24 }
   0xb   :  { %p537_p6 = por %p536_p5, %p535_p4 }
   0xd   :  { %p538_p7 = pnand %p537_p6, %p531_p3 }
   0xf   :  { %541 = shalt.err (!%p538_p7)
}
  0x10   :  { %s569_s25 = smov 128   ;;  %s570_s26 = smov 8  }
  0x11   :  { %24 = dma.hbm_to_vmem [thread:$0]  %s708_s1, 2048, %s19_s16, [#allocation3], %s569_s25, %s569_s25, %s570_s26  }
  0x12   :  { %564 = dma.done.wait [#allocation3], 2048  }
  0x13   :  { %565 = vsyncadd [#allocation3], 4294965248  ;;  %v32_v0 = vld [vmem:[%s707_s0] sm:$0xff]  ;;  %v33_v1 = vld [vmem:[%s707_s0 + $0x8] sm:$0xff]  ;;  %s571_s1 = smov 126   ;;  %v572_v39 = vmov 1   ;;  %v81_v63 = vlaneseq }
  0x14   :  { %34 = vmax.xlane.f32.xlu0 %v32_v0  ;;  %v627_v2 = vld [vmem:[%s709_s2] sm:$0xff]  ;;  %v53_v5 = vld [vmem:[#allocation2 + $0x8] sm:$0xff]  ;;  %v54_v6 = vld [vmem:[#allocation2 + $0x10] sm:$0xff]  ;;  %v574_v43 = vmov 0   ;;  %v575_v56 = vmov 3   ;;  %v576_v59 = vmov 2  }
  0x15   :  { %v218_v3 = vmul.f32 0.5, %v627_v2  ;;  %v52_v4 = vld [vmem:[#allocation2] sm:$0xff]  ;;  %v55_v8 = vld [vmem:[#allocation2 + $0x18] sm:$0xff]  ;;  %v57_v11 = vld [vmem:[#allocation2 + $0x28] sm:$0xff]  ;;  %495 = vset.pattern.permute.xlu0 %v572_v39  ;;  %493 = vset.pattern.permute.xlu1 %v574_v43 }
  0x16   :  { %v451_v7 = vpack.c.bf16 %v53_v5, %v52_v4  ;;  %v455_v9 = vpack.c.bf16 %v55_v8, %v54_v6  ;;  %v56_v10 = vld [vmem:[#allocation2 + $0x20] sm:$0xff]  ;;  %v58_v13 = vld [vmem:[#allocation2 + $0x30] sm:$0xff]  ;;  %v59_v14 = vld [vmem:[#allocation2 + $0x38] sm:$0xff] }
  0x17   :  { %v459_v12 = vpack.c.bf16 %v57_v11, %v56_v10  ;;  %v463_v15 = vpack.c.bf16 %v59_v14, %v58_v13  ;;  %v60_v24 = vld [vmem:[#allocation2 + $0x40] sm:$0xff]  ;;  %v61_v25 = vld [vmem:[#allocation2 + $0x48] sm:$0xff]  ;;  %v62_v29 = vld [vmem:[#allocation2 + $0x50] sm:$0xff] }
  0x18   :  { %36 = vmax.xlane.f32.xlu0 %v33_v1  ;;  %452 = vmatprep.subr.bf16.mxu0 %v451_v7  ;;  %v467_v26 = vpack.c.bf16 %v61_v25, %v60_v24  ;;  %v634_v28 = vld [vmem:[%s709_s2 + $0x8] sm:$0xff]  ;;  %v63_v30 = vld [vmem:[#allocation2 + $0x58] sm:$0xff]  ;;  %v64_v35 = vld [vmem:[#allocation2 + $0x60] sm:$0xff]  ;;  %s573_s2 = smov 127  }
  0x19   :  { %454 = vmatpush3.bf16.msra.mxu0 %v451_v7  ;;  %v219_v33 = vmul.f32 0.5, %v634_v28  ;;  %v471_v34 = vpack.c.bf16 %v63_v30, %v62_v29  ;;  %v65_v36 = vld [vmem:[#allocation2 + $0x68] sm:$0xff]  ;;  %v66_v40 = vld [vmem:[#allocation2 + $0x70] sm:$0xff]  ;;  %v67_v41 = vld [vmem:[#allocation2 + $0x78] sm:$0xff] }
  0x1a   :  { %456 = vmatprep.subr.bf16.mxu0 %v455_v9  ;;  %v475_v38 = vpack.c.bf16 %v65_v36, %v64_v35  ;;  %v479_v42 = vpack.c.bf16 %v67_v41, %v66_v40  ;;  %v655_v61 = vld [vmem:[%s710_s3] sm:$0xf]  ;;  %s577_s3 = smov [#allocation5]  }
  0x1b   :  { %s386_s12 = sshll.u32 %s577_s3, 4  ;;  %s387_s12 = int_to_ptr.vmem [resolvable:$true] %s386_s12 }
  0x1c   :  { %s542_s13 = scalar_lea.vmem %s387_s12, 256  ;;  %p547_p9 = scmp.lt.s32.totalorder %s387_s12, %s387_s12 }
  0x1d   :  { %458 = vmatpush3.bf16.msra.mxu0 %v455_v9  ;;  %p543_p8 = scmp.ne.s32.totalorder %s387_s12, %s542_s13  ;;  %p548_p10 = scmp.lt.s32.totalorder %s542_s13, %s542_s13 }
  0x1e   :  { %460 = vmatprep.subr.bf16.mxu0 %v459_v12 }
  0x1f   :  { %p549_p11 = por %p548_p10, %p547_p9 }
  0x21   :  { %462 = vmatpush3.bf16.msra.mxu0 %v459_v12  ;;  %p550_p12 = pnand %p549_p11, %p543_p8 }
  0x22   :  { %464 = vmatprep.subr.bf16.mxu0 %v463_v15 }
  0x25   :  { %466 = vmatpush3.bf16.msra.mxu0 %v463_v15 }
  0x26   :  { %468 = vmatprep.subr.bf16.mxu0 %v467_v26 }
  0x29   :  { %470 = vmatpush3.bf16.msra.mxu0 %v467_v26 }
  0x2a   :  { %472 = vmatprep.subr.bf16.mxu0 %v471_v34 }
  0x2d   :  { %474 = vmatpush3.bf16.msra.mxu0 %v471_v34 }
  0x2e   :  { %222 = vrot.lane.b32.xlu0 %v218_v3, %s571_s1  ;;  %476 = vmatprep.subr.bf16.mxu0 %v475_v38  ;;  %v658_v3 = vshrl.u32 %v81_v63, 7 }
  0x30   :  { %v661_v6 = vsub.s32 1, %v658_v3  ;;  %v670_v11 = vsub.s32 0, %v658_v3 }
  0x31   :  { %478 = vmatpush3.bf16.msra.mxu0 %v475_v38 }
  0x32   :  { %480 = vmatprep.subr.bf16.mxu0 %v479_v42 }
  0x35   :  { %482 = vmatpush3.bf16.msra.mxu0 %v479_v42 }
  0xa1   :  { %v35_v16 = vpop.xlane.xlu0 %34 }
  0xa2   :  { %v38_v17 = vsub.f32 %v32_v0, %v35_v16 }
  0xa4   :  { %v40_v18 = vmul.f32 1.442695, %v38_v17 }
  0xa5   :  { %v37_v19 = vpop.xlane.xlu0 %36 }
  0xa6   :  { %504 = vpow2.f32 %v40_v18  ;;  %v39_v20 = vsub.f32 %v33_v1, %v37_v19  ;;  %v232_v1 = vmul.f32 0.5, %v655_v61 }
  0xa8   :  { %v42_v21 = vmul.f32 1.442695, %v39_v20  ;;  %v234_v4 = vrot.slane %v232_v1, 2 }
  0xa9   :  { %v223_v27 = vpop.permute.xlu0 %222 }
  0xaa   :  { %506 = vpow2.f32 %v42_v21  ;;  %v228_v31 = vsub.f32 %v627_v2, %v223_v27  ;;  %v230_v32 = vadd.f32 %v223_v27, %v627_v2  ;;  %v236_v7 = vsub.f32 %v655_v61, %v234_v4 }
  0xab   :  { %v237_v10 = vadd.f32 %v234_v4, %v655_v61 }
  0xac   :  { %v238_v37 = vsub.f32 %v230_v32, %v228_v31  ;;  %v316_v12 = vrot.slane %v236_v7, %v661_v6  ;;  %v284_v14 = vrot.slane %v236_v7, %v670_v11 }
  0xad   :  { %v250_v15 = vsub.f32 %v237_v10, %v236_v7  ;;  %v302_v17 = vrot.slane %v237_v10, %v661_v6  ;;  %v268_v18 = vrot.slane %v237_v10, %v670_v11  ;;  %v135_v7 = vsub.s32 3, %v658_v3 }
  0xb0   :  { %v505_v22 = vpop.eup %504 }
  0xb1   :  { %44 = vadd.xlane.f32.xlu1 %v505_v22 }
  0xb4   :  { %v507_v23 = vpop.eup %506 }
  0xb5   :  { %46 = vadd.xlane.f32.xlu1 %v507_v23 }
  0xc6   :  { %224 = vrot.lane.b32.xlu1 %v219_v33, %s571_s1 }
  0xca   :  { %242 = vrot.lane.b32.xlu1 %v238_v37, %s573_s2 }
 0x13e   :  { %v45_v44 = vpop.xlane.xlu1 %44 }
 0x13f   :  { %508 = vrcp.f32 %v45_v44 }
 0x142   :  { %v47_v45 = vpop.xlane.xlu1 %46 }
 0x143   :  { %510 = vrcp.f32 %v47_v45 }
 0x146   :  { %v225_v46 = vpop.permute.xlu1 %224 }
 0x147   :  { %v229_v47 = vsub.f32 %v634_v28, %v225_v46  ;;  %v231_v48 = vadd.f32 %v225_v46, %v634_v28 }
 0x149   :  { %v509_v49 = vpop.eup %508  ;;  %296 = vperm.xlu0 %495, %v231_v48   ;;  %v239_v50 = vsub.f32 %v231_v48, %v229_v47 }
 0x14a   :  { %v50_v51 = vmul.f32 %v509_v49, %v505_v22  ;;  %v243_v54 = vpop.permute.xlu1 %242  ;;  %v252_v22 = vrot.slane %v250_v15, 1 }
 0x14b   :  { %244 = vrot.lane.b32.xlu1 %v239_v50, %s573_s2  ;;  %v248_v55 = vmul.f32 %v243_v54, %v238_v37 }
 0x14c   :  { %448 = vmatprep.mubr.f32.mxu0 %v50_v51  ;;  %v254_v27 = vmul.f32 %v252_v22, %v250_v15 }
 0x14d   :  { %v511_v52 = vpop.eup %510  ;;  %496 = vset.pattern.permute.xlu0 %v574_v43 }
 0x14e   :  { %257 = vperm.xlu0 %496, %v230_v32   ;;  %v51_v53 = vmul.f32 %v511_v52, %v507_v23  ;;  %v338_v35 = vrot.slane %v254_v27, %v670_v11 }
 0x14f   :  { %262 = vperm.xlu1 %493, %v231_v48  }
 0x150   :  { %449 = vmatmul.mubr.f32.vlgmr.msra.gmra.mrb[0].mxu0 %v51_v53 }
 0x152   :  { %278 = vperm.xlu0 %496, %v229_v47  }
 0x153   :  { %273 = vperm.xlu1 %493, %v228_v31  }
 0x156   :  { %78 = vperm.xlu0 %496, %v634_v28  }
 0x157   :  { %494 = vset.pattern.permute.xlu1 %v572_v39 }
 0x158   :  { %292 = vperm.xlu1 %494, %v230_v32  }
 0x15a   :  { %327 = vperm.xlu0 %496, %v248_v55  }
 0x15c   :  { %306 = vperm.xlu1 %494, %v228_v31  }
 0x15e   :  { %499 = vset.pattern.permute.xlu0 %v572_v39 }
 0x15f   :  { %94 = vperm.xlu0 %499, %v634_v28  }
 0x160   :  { %310 = vperm.xlu1 %494, %v229_v47  }
 0x163   :  { %501 = vset.pattern.permute.xlu0 %v575_v56 }
 0x164   :  { %497 = vset.pattern.permute.xlu1 %v574_v43  ;;  %126 = vperm.xlu0 %501, %v627_v2  }
 0x165   :  { %73 = vperm.xlu1 %497, %v627_v2  }
 0x168   :  { %503 = vset.pattern.permute.xlu0 %v574_v43 }
 0x1bd   :  { %v245_v57 = vpop.permute.xlu1 %244 }
 0x1be   :  { %v249_v58 = vmul.f32 %v245_v57, %v239_v50 }
 0x1c0   :  { %332 = vperm.xlu1 %497, %v249_v58  }
 0x1c4   :  { %498 = vset.pattern.permute.xlu1 %v572_v39 }
 0x1c5   :  { %90 = vperm.xlu1 %498, %v627_v2  }
 0x1c8   :  { %v297_v0 = vpop.permute.xlu0 %296 }
 0x1c9   :  { %500 = vset.pattern.permute.xlu1 %v576_v59  ;;  %v304_v41 = vmin.f32 %v297_v0, %v302_v17  ;;  %v358_v51 = vmax.f32 %v297_v0, %v302_v17 }
 0x1ca   :  { %108 = vperm.xlu1 %500, %v627_v2  }
 0x1cd   :  { %v258_v5 = vpop.permute.xlu0 %257 }
 0x1ce   :  { %112 = vperm.xlu1 %500, %v634_v28   ;;  %v650_v60 = vpop.permute.xlu1 %262  ;;  %v269_v23 = vmin.f32 %v258_v5, %v268_v18  ;;  %v349_v33 = vmax.f32 %v258_v5, %v268_v18 }
 0x1cf   :  { %v270_v45 = vmin.f32 %v650_v60, %v268_v18  ;;  %v350_v55 = vmax.f32 %v650_v60, %v268_v18  ;;  %v100_v60 = vrot.slane %v655_v61, %v661_v6  ;;  %v136_v18 = vrot.slane %v655_v61, %v135_v7 }
 0x1d1   :  { %v279_v16 = vpop.permute.xlu0 %278 }
 0x1d2   :  { %502 = vset.pattern.permute.xlu1 %v575_v56  ;;  %v274_v62 = vpop.permute.xlu1 %273  ;;  %v286_v42 = vmax.f32 %v279_v16, %v284_v14  ;;  %v352_v53 = vmin.f32 %v279_v16, %v284_v14 }
 0x1d3   :  { %130 = vperm.xlu1 %502, %v634_v28   ;;  %v285_v20 = vmax.f32 %v274_v62, %v284_v14  ;;  %v351_v29 = vmin.f32 %v274_v62, %v284_v14  ;;  %v84_v14 = vrot.slane %v655_v61, %v670_v11 }
 0x1d4   :  { %v288_v52 = vsub.f32 %v270_v45, %v286_v42  ;;  %v354_v62 = vsub.f32 %v350_v55, %v352_v53 }
 0x1d5   :  { %v676_v25 = vpop.permute.xlu0 %78  ;;  %v287_v26 = vsub.f32 %v269_v23, %v285_v20  ;;  %v353_v39 = vsub.f32 %v349_v33, %v351_v29 }
 0x1d6   :  { %v290_v59 = vmax.f32 %v288_v52, 0.0  ;;  %v356_v0 = vmax.f32 %v354_v62, 0.0  ;;  %v86_v11 = vsub.f32 %v676_v25, %v84_v14 }
 0x1d7   :  { %v293_v2 = vpop.permute.xlu1 %292  ;;  %v289_v34 = vmax.f32 %v287_v26, 0.0  ;;  %v355_v48 = vmax.f32 %v353_v39, 0.0 }
 0x1d8   :  { %v303_v21 = vmin.f32 %v293_v2, %v302_v17  ;;  %v357_v30 = vmax.f32 %v293_v2, %v302_v17 }
 0x1d9   :  { %v328_v37 = vpop.permute.xlu0 %327 }
 0x1da   :  { %v339_v43 = vadd.f32 %v338_v35, %v328_v37 }
 0x1db   :  { %v307_v13 = vpop.permute.xlu1 %306 }
 0x1dc   :  { %v317_v19 = vmax.f32 %v307_v13, %v316_v12  ;;  %v359_v28 = vmin.f32 %v307_v13, %v316_v12  ;;  %v117_v13 = vsub.s32 2, %v658_v3 }
 0x1de   :  { %v319_v24 = vsub.f32 %v303_v21, %v317_v19  ;;  %v361_v36 = vsub.f32 %v357_v30, %v359_v28  ;;  %v95_v10 = vpop.permute.xlu0 %94  ;;  %v118_v22 = vrot.slane %v655_v61, %v117_v13 }
 0x1df   :  { %v311_v32 = vpop.permute.xlu1 %310  ;;  %v102_v29 = vsub.f32 %v95_v10, %v100_v60 }
 0x1e0   :  { %v321_v31 = vmax.f32 %v319_v24, 0.0  ;;  %v318_v38 = vmax.f32 %v311_v32, %v316_v12  ;;  %v363_v44 = vmax.f32 %v361_v36, 0.0  ;;  %v360_v47 = vmin.f32 %v311_v32, %v316_v12 }
 0x1e1   :  { %v104_v39 = vand.u32 2147483647, %v102_v29 }
 0x1e2   :  { %v323_v40 = vmul.f32 %v321_v31, %v289_v34  ;;  %v320_v46 = vsub.f32 %v304_v41, %v318_v38  ;;  %v365_v54 = vmul.f32 %v363_v44, %v355_v48  ;;  %v362_v57 = vsub.f32 %v358_v51, %v360_v47 }
 0x1e3   :  { %v127_v20 = vpop.permute.xlu0 %126  ;;  %v88_v38 = vand.u32 2147483647, %v86_v11 }
 0x1e4   :  { %v341_v49 = vsub.f32 %v339_v43, %v323_v40  ;;  %v74_v50 = vpop.permute.xlu1 %73  ;;  %v322_v56 = vmax.f32 %v320_v46, 0.0  ;;  %v369_v63 = vadd.f32 1e-08, %v365_v54  ;;  %v364_v2 = vmax.f32 %v362_v57, 0.0 }
 0x1e5   :  { %v85_v21 = vsub.f32 %v74_v50, %v84_v14  ;;  %v137_v24 = vsub.f32 %v127_v20, %v136_v18  ;;  %v106_v47 = vadd.f32 %v104_v39, %v88_v38 }
 0x1e6   :  { %v343_v58 = vadd.f32 1e-08, %v341_v49  ;;  %v324_v4 = vmul.f32 %v322_v56, %v290_v59  ;;  %v366_v15 = vmul.f32 %v364_v2, %v356_v0  ;;  %v367_v36 = vsub.f32 %v365_v54, %v341_v49 }
 0x1e7   :  { %v87_v27 = vand.u32 2147483647, %v85_v21  ;;  %v139_v32 = vand.u32 2147483647, %v137_v24 }
 0x1e8   :  { %512 = vrcp.f32 %v343_v58  ;;  %v370_v23 = vadd.f32 1e-08, %v366_v15 }
 0x1e9   :  { %514 = vrcp.f32 %v369_v63 }
 0x1f2   :  { %v513_v28 = vpop.eup %512 }
 0x1f3   :  { %v515_v33 = vpop.eup %514 }
 0x1f4   :  { %v373_v42 = vmul.f32 %v515_v33, %v367_v36 }
 0x223   :  { %v664_v8 = vpop.f32.mrb[0].mxu0 }
 0x224   :  { %v666_v9 = vpop.f32.mrb[1].mxu0 }
 0x23f   :  { %v333_v1 = vpop.permute.xlu1 %332 }
 0x240   :  { %v340_v5 = vadd.f32 %v338_v35, %v333_v1  ;;  %v347_v35 = vmul.f32 %v513_v28, %v323_v40 }
 0x242   :  { %v342_v12 = vsub.f32 %v340_v5, %v324_v4  ;;  %v375_v46 = vsub.f32 %v347_v35, %v373_v42 }
 0x244   :  { %v344_v16 = vadd.f32 1e-08, %v342_v12  ;;  %v91_v17 = vpop.permute.xlu1 %90  ;;  %v368_v48 = vsub.f32 %v366_v15, %v342_v12 }
 0x245   :  { %v101_v19 = vsub.f32 %v91_v17, %v100_v60 }
 0x246   :  { %516 = vrcp.f32 %v344_v16 }
 0x247   :  { %v103_v3 = vand.u32 2147483647, %v101_v19  ;;  %518 = vrcp.f32 %v370_v23 }
 0x249   :  { %v109_v26 = vpop.permute.xlu1 %108  ;;  %v105_v30 = vadd.f32 %v103_v3, %v87_v27 }
 0x24a   :  { %v119_v6 = vsub.f32 %v109_v26, %v118_v22 }
 0x24c   :  { %v121_v31 = vand.u32 2147483647, %v119_v6 }
 0x24d   :  { %v113_v34 = vpop.permute.xlu1 %112 }
 0x24e   :  { %v123_v61 = vadd.f32 %v121_v31, %v105_v30  ;;  %v120_v37 = vsub.f32 %v113_v34, %v118_v22 }
 0x250   :  { %v141_v41 = vadd.f32 %v139_v32, %v123_v61  ;;  %v122_v43 = vand.u32 2147483647, %v120_v37  ;;  %v517_v44 = vpop.eup %516 }
 0x251   :  { %v348_v52 = vmul.f32 %v517_v44, %v324_v4  ;;  %v519_v49 = vpop.eup %518 }
 0x252   :  { %v210_v45 = vadd.f32 %v666_v9, %v141_v41  ;;  %v131_v25 = vpop.permute.xlu1 %130  ;;  %v124_v53 = vadd.f32 %v122_v43, %v106_v47  ;;  %v374_v54 = vmul.f32 %v519_v49, %v368_v48 }
 0x253   :  { %v138_v50 = vsub.f32 %v131_v25, %v136_v18 }
 0x254   :  { %v377_v51 = vsub.f32 %v210_v45, %v375_v46  ;;  %v376_v57 = vsub.f32 %v348_v52, %v374_v54 }
 0x255   :  { %v140_v40 = vand.u32 2147483647, %v138_v50 }
 0x256   :  { %379 = vst [vmem:[#allocation5] sm:$0xff] %v377_v51 }
 0x257   :  { %v142_v55 = vadd.f32 %v140_v40, %v124_v53 }
 0x259   :  { %v215_v56 = vadd.f32 %v664_v8, %v142_v55 }
 0x25b   :  { %v378_v58 = vsub.f32 %v215_v56, %v376_v57 }
 0x25d   :  { %380 = vst [vmem:[#allocation5 + $0x8] sm:$0xff] %v378_v58 }
 0x25e   :  { %553 = shalt.err (!%p550_p12)
}
 0x25f   :  { %s554_s16 = scalar_lea.hbm %s711_s4, 256 }
 0x260   :  { %p555_p13 = scmp.ne.s32.totalorder %s711_s4, %s554_s16  ;;  %p558_p0 = scmp.lt.u32.totalorder %s554_s16, %s711_s4 }
 0x262   :  { %p560_p1 = pnand %p558_p0, %p555_p13 }
 0x264   :  { %563 = shalt.err (!%p560_p1)
}
 0x265   :  { %392 = dma.vmem_to_hbm [thread:$0]  %s387_s12, 256, %s711_s4, [#allocation4], %s569_s25, %s569_s25, %s570_s26  }
 0x266   :  { %566 = dma.done.wait [#allocation4], 256  }
 0x267   :  { %567 = vsyncadd [#allocation4], 4294967040 }
 0x268   :  { %396 = vsyncpa [#allocation3], 1 }
 0x269   :  { %397 = vsyncpa [#allocation4], 1 }

</bundles_post_ra>
